<compile_context>
chip_gen: v7x
topology: tpu7x:2x2x1
jax: 0.10.0
libtpu: 0.0.40
codegen_flags: <defaults>
</compile_context>

<pallas_src>
import jax
import jax.numpy as jnp
from jax.experimental import pallas as pl
from jax.experimental.pallas import tpu as pltpu

LANE = 128                     # lane width (last dim)
TILE = 256                     # row / K tile for the tiled path (v6e/v7x MXU height)
RESIDENT_BUDGET = 24 << 20     # operand-footprint threshold for the resident fast path


def _round_up(x, m):
    return ((x + m - 1) // m) * m


def _pad2d(x, rows, cols, dtype=None):
    r, c = x.shape
    out = jnp.pad(x, ((0, rows - r), (0, cols - c)))
    return out.astype(dtype) if dtype is not None else out


# ----------------------------------------------------------------------------
# Kernels
# ----------------------------------------------------------------------------
def make_fused_gcn_kernel(num_hidden, orders):
    """Whole forward in one kernel: A_hat resident, intermediates never leave VMEM."""

    def kernel(a_ref, x_ref, *refs):
        out_ref = refs[-1]
        p = refs[:-1]
        a = a_ref[...]                               # bf16 (Npad, Npad), loaded once
        h = x_ref[...]                               # bf16 (Npad, Fpad)
        for li in range(num_hidden):                 # unrolled at trace time
            w = p[2 * li][...]                       # bf16 (din_p, dout_p)
            b = p[2 * li + 1][...]                   # f32  (1, dout_p)
            if orders[li] == "a_first":              # (A@H)@W + b   (d_out > d_in)
                y = jnp.dot(a, h, preferred_element_type=jnp.float32).astype(jnp.bfloat16)
                h = jnp.dot(y, w, preferred_element_type=jnp.float32) + b
            else:                                    # A@(H@W + b)   (d_out <= d_in)
                z = (jnp.dot(h, w, preferred_element_type=jnp.float32) + b).astype(jnp.bfloat16)
                h = jnp.dot(a, z, preferred_element_type=jnp.float32)
            h = jnp.maximum(h, 0.0).astype(jnp.bfloat16)   # bias/ReLU in f32, carry bf16
        w_fc = p[2 * num_hidden][...]                # bf16 (Hpad, Cpad), pre-transposed
        b_fc = p[2 * num_hidden + 1][...]            # f32  (1, Cpad)
        out_ref[...] = jnp.dot(h, w_fc, preferred_element_type=jnp.float32) + b_fc

    return kernel


def make_linear_kernel(apply_relu):
    """Row-tiled  H @ W + b  (optional ReLU). W/b resident, rows parallel."""

    def kernel(h_ref, w_ref, b_ref, o_ref):
        y = jnp.dot(h_ref[...], w_ref[...], preferred_element_type=jnp.float32) + b_ref[...]
        if apply_relu:
            y = jnp.maximum(y, 0.0)
        o_ref[...] = y.astype(o_ref.dtype)

    return kernel


def make_a_matmul_kernel(apply_relu):
    """Row/K-tiled  A_hat @ Z  with f32 VMEM accumulator (optional ReLU)."""

    def kernel(a_ref, z_ref, o_ref, acc_ref):
        k = pl.program_id(1)

        @pl.when(k == 0)
        def _():
            acc_ref[...] = jnp.zeros_like(acc_ref)

        acc_ref[...] += jnp.dot(a_ref[...], z_ref[...],
                                preferred_element_type=jnp.float32)

        @pl.when(k == pl.num_programs(1) - 1)
        def _():
            r = acc_ref[...]
            if apply_relu:
                r = jnp.maximum(r, 0.0)
            o_ref[...] = r.astype(o_ref.dtype)

    return kernel


# ----------------------------------------------------------------------------
# Tiled-path wrappers
# ----------------------------------------------------------------------------
def _linear_tiled(h, w, b, *, relu, out_dtype, tile_m):
    n_pad, d_in = h.shape
    d_out = w.shape[1]
    return pl.pallas_call(
        make_linear_kernel(relu),
        out_shape=jax.ShapeDtypeStruct((n_pad, d_out), out_dtype),
        grid=(n_pad // tile_m,),
        in_specs=[pl.BlockSpec((tile_m, d_in), lambda i: (i, 0)),
                  pl.BlockSpec((d_in, d_out), lambda i: (0, 0)),
                  pl.BlockSpec((1, d_out), lambda i: (0, 0))],
        out_specs=pl.BlockSpec((tile_m, d_out), lambda i: (i, 0)),
        compiler_params=pltpu.CompilerParams(dimension_semantics=("parallel",)),
    )(h, w, b)


def _a_matmul_tiled(a_pad, z, *, relu, out_dtype, tile_m, tile_k):
    n_pad = a_pad.shape[0]
    dz = z.shape[1]
    # TODO(synk): for very large N, hold Z (and per-layer activations) resident in a
    # persistent VMEM scratch (constant index_map + pl.ds K-slicing) instead of
    # re-streaming Z K-tiles once per row tile.
    return pl.pallas_call(
        make_a_matmul_kernel(relu),
        out_shape=jax.ShapeDtypeStruct((n_pad, dz), out_dtype),
        grid=(n_pad // tile_m, n_pad // tile_k),
        in_specs=[pl.BlockSpec((tile_m, tile_k), lambda i, k: (i, k)),
                  pl.BlockSpec((tile_k, dz), lambda i, k: (k, 0))],
        out_specs=pl.BlockSpec((tile_m, dz), lambda i, k: (i, 0)),
        scratch_shapes=[pltpu.VMEM((tile_m, dz), jnp.float32)],
        compiler_params=pltpu.CompilerParams(
            dimension_semantics=("parallel", "arbitrary")),
    )(a_pad, z)


# ----------------------------------------------------------------------------
# Model
# ----------------------------------------------------------------------------
class PallasGCN:
    """JAX/Pallas port of the PyTorch GCN forward pass."""

    def __init__(self, key, x_size, a_hat, hidden_sizes, num_classes,
                 bias=True, force_tiled=False):
        assert len(hidden_sizes) >= 1
        self.num_classes = num_classes
        self.has_bias = bias
        n = a_hat.shape[0]
        self.n_nodes = n

        all_sizes = [x_size, *hidden_sizes, num_classes]

        # ---- raw f32 parameters (torch-init parity; used by the reference) ----
        self.weights, self.biases = [], []
        for i in range(len(hidden_sizes)):
            din, dout = all_sizes[i], all_sizes[i + 1]
            var = 2.0 / (din + dout)          # torch: .normal_(0, var) -> std = var
            key, k1, k2 = jax.random.split(key, 3)
            self.weights.append(var * jax.random.normal(k1, (din, dout), jnp.float32))
            if bias:
                self.biases.append(var * jax.random.normal(k2, (dout,), jnp.float32))
            else:
                self.biases.append(jnp.zeros((dout,), jnp.float32))

        hin = hidden_sizes[-1]
        bound = 1.0 / (hin ** 0.5)            # nn.Linear default init
        key, k1, k2 = jax.random.split(key, 3)
        self.fc1_w = jax.random.uniform(k1, (num_classes, hin), jnp.float32,
                                        minval=-bound, maxval=bound)
        self.fc1_b = jax.random.uniform(k2, (num_classes,), jnp.float32,
                                        minval=-bound, maxval=bound)

        # ---- padded / pre-cast kernel-side copies (computed once) ----
        self.w_pad, self.b_pad, self.layer_dims_pad = [], [], []
        for w, b in zip(self.weights, self.biases):
            din, dout = w.shape
            dinp, doutp = _round_up(din, LANE), _round_up(dout, LANE)
            self.w_pad.append(_pad2d(w, dinp, doutp, jnp.bfloat16))
            self.b_pad.append(_pad2d(b.reshape(1, dout), 1, doutp, jnp.float32))
            self.layer_dims_pad.append((dinp, doutp))
        hinp = _round_up(hin, LANE)
        self.c_pad = _round_up(num_classes, LANE)
        self.fc1_wt_pad = _pad2d(self.fc1_w.T, hinp, self.c_pad, jnp.bfloat16)
        self.fc1_b_pad = _pad2d(self.fc1_b.reshape(1, num_classes), 1, self.c_pad,
                                jnp.float32)

        # Per-layer matmul order: the big N^2 matmul carries whichever of
        # d_in/d_out sits on its side, so pick the smaller (on padded dims).
        self.orders = ["a_first" if doutp > dinp else "zw_first"
                       for (dinp, doutp) in self.layer_dims_pad]

        self.f_pad = _round_up(x_size, LANE)

        # ---- size-aware dispatch + A_hat padded & cast to bf16 ONCE ----
        a_hat = jnp.asarray(a_hat, jnp.float32)
        n_res = _round_up(n, LANE)
        param_bytes = (sum(int(w.nbytes) + int(b.nbytes)
                           for w, b in zip(self.w_pad, self.b_pad))
                       + int(self.fc1_wt_pad.nbytes) + int(self.fc1_b_pad.nbytes))
        act_cols = max(self.f_pad, self.c_pad, *(d for _, d in self.layer_dims_pad))
        resident_bytes = (2 * n_res * n_res           # bf16 A_hat
                          + 2 * n_res * self.f_pad    # bf16 x
                          + param_bytes
                          + 4 * n_res * self.c_pad    # f32 output slab
                          + 3 * 4 * n_res * act_cols)  # in-kernel f32 intermediates
        self.use_tiled = force_tiled or resident_bytes > RESIDENT_BUDGET

        if self.use_tiled:
            self.n_pad = _round_up(n, TILE)
            self._vmem_limit = None
        else:
            self.n_pad = n_res
            self._vmem_limit = int(min(64 << 20, max(32 << 20, 2 * resident_bytes)))
        self.a_pad = _pad2d(a_hat, self.n_pad, self.n_pad, jnp.bfloat16)

    # ------------------------------------------------------------------ #
    def __call__(self, vals):
        n, _ = vals.shape
        assert n == self.n_nodes
        x_pad = _pad2d(jnp.asarray(vals, jnp.float32), self.n_pad, self.f_pad,
                       jnp.bfloat16)
        if self.use_tiled:
            out_pad = self._forward_tiled(x_pad)
        else:
            out_pad = self._forward_resident(x_pad)
        # Slice the lane-dense slab back to the logical (N, num_classes) result.
        return out_pad[:n, :self.num_classes]

    # ------------------------------------------------------------------ #
    def _forward_resident(self, x_pad):
        flat = []
        for w, b in zip(self.w_pad, self.b_pad):
            flat += [w, b]
        flat += [self.fc1_wt_pad, self.fc1_b_pad]
        operands = [self.a_pad, x_pad, *flat]

        n_pad, c_pad = self.n_pad, self.c_pad
        flops = 0
        for (dinp, doutp), order in zip(self.layer_dims_pad, self.orders):
            small = dinp if order == "a_first" else doutp
            flops += 2 * n_pad * n_pad * small + 2 * n_pad * dinp * doutp
        flops += 2 * n_pad * self.fc1_wt_pad.shape[0] * c_pad
        bytes_accessed = sum(int(op.nbytes) for op in operands) + 4 * n_pad * c_pad

        in_specs = [pl.BlockSpec(op.shape, lambda: (0, 0)) for op in operands]
        return pl.pallas_call(
            make_fused_gcn_kernel(len(self.w_pad), self.orders),
            out_shape=jax.ShapeDtypeStruct((n_pad, c_pad), jnp.float32),
            in_specs=in_specs,
            out_specs=pl.BlockSpec((n_pad, c_pad), lambda: (0, 0)),
            compiler_params=pltpu.CompilerParams(
                vmem_limit_bytes=self._vmem_limit),
            cost_estimate=pl.CostEstimate(flops=int(flops), transcendentals=0,
                                          bytes_accessed=int(bytes_accessed)),
        )(*operands)

    # ------------------------------------------------------------------ #
    def _forward_tiled(self, x_pad):
        tile_m = tile_k = TILE
        h = x_pad
        for li, (w, b) in enumerate(zip(self.w_pad, self.b_pad)):
            if self.orders[li] == "a_first":
                y = _a_matmul_tiled(self.a_pad, h, relu=False,
                                    out_dtype=jnp.bfloat16,
                                    tile_m=tile_m, tile_k=tile_k)
                h = _linear_tiled(y, w, b, relu=True,
                                  out_dtype=jnp.bfloat16, tile_m=tile_m)
            else:
                z = _linear_tiled(h, w, b, relu=False,
                                  out_dtype=jnp.bfloat16, tile_m=tile_m)
                h = _a_matmul_tiled(self.a_pad, z, relu=True,
                                    out_dtype=jnp.bfloat16,
                                    tile_m=tile_m, tile_k=tile_k)
        # TODO(synk): fuse the layer loop into one pallas_call with the activations
        # held in persistent VMEM scratch; as written H (N x d, bf16) round-trips
        # HBM between layers, which is small next to the per-layer A_hat traffic.
        return _linear_tiled(h, self.fc1_wt_pad, self.fc1_b_pad, relu=False,
                             out_dtype=jnp.float32, tile_m=tile_m)


# ----------------------------------------------------------------------------
# Pure-JAX f32 reference (matches the PyTorch forward)
# ----------------------------------------------------------------------------
def gcn_forward_ref(model, a_hat, vals):
    a_hat = jnp.asarray(a_hat, jnp.float32)
    vals = jnp.asarray(vals, jnp.float32)
    for w, b in zip(model.weights, model.biases):
        vals = jnp.maximum(a_hat @ (vals @ w + b), 0.0)
    return vals @ model.fc1_w.T + model.fc1_b


def make_graph(key, n_nodes, x_size):
    kx, ka = jax.random.split(key)
    x = jax.random.normal(kx, (n_nodes, x_size), jnp.float32)
    adj = (jax.random.uniform(ka, (n_nodes, n_nodes)) > 0.6).astype(jnp.float32)
    adj = jnp.maximum(adj, adj.T) + jnp.eye(n_nodes, dtype=jnp.float32)
    deg = jnp.sum(adj, axis=1)
    d_inv_sqrt = 1.0 / jnp.sqrt(deg)
    a_hat = adj * d_inv_sqrt[:, None] * d_inv_sqrt[None, :]
    return x, a_hat


if __name__ == "__main__":
    key = jax.random.PRNGKey(0)
    k1, k2, kp1, kp2 = jax.random.split(key, 4)

    # --- Test 1: small graph, fully-resident fused fast path ---------------
    n1, xs1, hidden1, classes1 = 8, 16, [32, 16], 4
    x1, a1 = make_graph(k1, n1, xs1)
    m1 = PallasGCN(kp1, xs1, a1, hidden1, classes1)
    assert not m1.use_tiled
    out1 = jax.block_until_ready(m1(x1))
    ref1 = gcn_forward_ref(m1, a1, x1)
    assert out1.shape == (n1, classes1)
    assert jnp.allclose(out1, ref1, atol=2e-2, rtol=2e-2), "resident path mismatch"

    # --- Test 2: medium graph, forced row/K-tiled path ----------------------
    #     (16->160 is 'a_first', 160->32 is 'zw_first': both orders exercised)
    n2, xs2, hidden2, classes2 = 300, 16, [160, 32], 4
    x2, a2 = make_graph(k2, n2, xs2)
    m2 = PallasGCN(kp2, xs2, a2, hidden2, classes2, force_tiled=True)
    assert m2.use_tiled
    out2 = jax.block_until_ready(m2(x2))
    ref2 = gcn_forward_ref(m2, a2, x2)
    assert out2.shape == (n2, classes2)
    assert jnp.allclose(out2, ref2, atol=2e-2, rtol=2e-2), "tiled path mismatch"

    # TODO(synk): real perf numbers need an xprof trace at realistic N (>= 4k nodes),
    # min over several runs; these smoke tests are launch-overhead dominated.
    print("KERNEL_OK")
</pallas_src>

<mosaic_0001>
module attributes {stable_mosaic.version = 11 : i64} {
  func.func @kernel(%arg0: memref<128x128xbf16, #tpu.memory_space<vmem>>, %arg1: memref<128x128xbf16, #tpu.memory_space<vmem>>, %arg2: memref<128x128xbf16, #tpu.memory_space<vmem>>, %arg3: memref<1x128xf32, #tpu.memory_space<vmem>>, %arg4: memref<128x128xbf16, #tpu.memory_space<vmem>>, %arg5: memref<1x128xf32, #tpu.memory_space<vmem>>, %arg6: memref<128x128xbf16, #tpu.memory_space<vmem>>, %arg7: memref<1x128xf32, #tpu.memory_space<vmem>>, %arg8: memref<128x128xf32, #tpu.memory_space<vmem>>) attributes {dimension_semantics = [], scalar_prefetch = 0 : i64, scratch_operands = 0 : i64, tpu.core_type = #tpu.core_type<tc>} {
    %c0 = arith.constant 0 : index
    %c0_0 = arith.constant 0 : index
    %0 = vector.load %arg0[%c0, %c0_0] : memref<128x128xbf16, #tpu.memory_space<vmem>>, vector<128x128xbf16>
    %c0_1 = arith.constant 0 : index
    %c0_2 = arith.constant 0 : index
    %1 = vector.load %arg1[%c0_1, %c0_2] : memref<128x128xbf16, #tpu.memory_space<vmem>>, vector<128x128xbf16>
    %c0_3 = arith.constant 0 : index
    %c0_4 = arith.constant 0 : index
    %2 = vector.load %arg2[%c0_3, %c0_4] : memref<128x128xbf16, #tpu.memory_space<vmem>>, vector<128x128xbf16>
    %c0_5 = arith.constant 0 : index
    %c0_6 = arith.constant 0 : index
    %3 = vector.load %arg3[%c0_5, %c0_6] : memref<1x128xf32, #tpu.memory_space<vmem>>, vector<1x128xf32>
    %cst = arith.constant dense<0.000000e+00> : vector<128x128xf32>
    %4 = tpu.matmul %1, %2, %cst {dimension_numbers = #tpu.dot_dimension_numbers<[1], [0], [0], [1], [0, 0, 1, 1], [], []>} : vector<128x128xbf16>, vector<128x128xbf16>, vector<128x128xf32> -> vector<128x128xf32>
    %5 = vector.broadcast %3 : vector<1x128xf32> to vector<128x128xf32>
    %6 = arith.addf %4, %5 : vector<128x128xf32>
    %7 = arith.truncf %6 : vector<128x128xf32> to vector<128x128xbf16>
    %cst_7 = arith.constant dense<0.000000e+00> : vector<128x128xf32>
    %8 = tpu.matmul %0, %7, %cst_7 {dimension_numbers = #tpu.dot_dimension_numbers<[1], [0], [0], [1], [0, 0, 1, 1], [], []>} : vector<128x128xbf16>, vector<128x128xbf16>, vector<128x128xf32> -> vector<128x128xf32>
    %cst_8 = arith.constant 0.000000e+00 : f32
    %9 = vector.broadcast %cst_8 : f32 to vector<128x128xf32>
    %10 = arith.maximumf %8, %9 : vector<128x128xf32>
    %11 = arith.truncf %10 : vector<128x128xf32> to vector<128x128xbf16>
    %c0_9 = arith.constant 0 : index
    %c0_10 = arith.constant 0 : index
    %12 = vector.load %arg4[%c0_9, %c0_10] : memref<128x128xbf16, #tpu.memory_space<vmem>>, vector<128x128xbf16>
    %c0_11 = arith.constant 0 : index
    %c0_12 = arith.constant 0 : index
    %13 = vector.load %arg5[%c0_11, %c0_12] : memref<1x128xf32, #tpu.memory_space<vmem>>, vector<1x128xf32>
    %cst_13 = arith.constant dense<0.000000e+00> : vector<128x128xf32>
    %14 = tpu.matmul %11, %12, %cst_13 {dimension_numbers = #tpu.dot_dimension_numbers<[1], [0], [0], [1], [0, 0, 1, 1], [], []>} : vector<128x128xbf16>, vector<128x128xbf16>, vector<128x128xf32> -> vector<128x128xf32>
    %15 = vector.broadcast %13 : vector<1x128xf32> to vector<128x128xf32>
    %16 = arith.addf %14, %15 : vector<128x128xf32>
    %17 = arith.truncf %16 : vector<128x128xf32> to vector<128x128xbf16>
    %cst_14 = arith.constant dense<0.000000e+00> : vector<128x128xf32>
    %18 = tpu.matmul %0, %17, %cst_14 {dimension_numbers = #tpu.dot_dimension_numbers<[1], [0], [0], [1], [0, 0, 1, 1], [], []>} : vector<128x128xbf16>, vector<128x128xbf16>, vector<128x128xf32> -> vector<128x128xf32>
    %cst_15 = arith.constant 0.000000e+00 : f32
    %19 = vector.broadcast %cst_15 : f32 to vector<128x128xf32>
    %20 = arith.maximumf %18, %19 : vector<128x128xf32>
    %21 = arith.truncf %20 : vector<128x128xf32> to vector<128x128xbf16>
    %c0_16 = arith.constant 0 : index
    %c0_17 = arith.constant 0 : index
    %22 = vector.load %arg6[%c0_16, %c0_17] : memref<128x128xbf16, #tpu.memory_space<vmem>>, vector<128x128xbf16>
    %c0_18 = arith.constant 0 : index
    %c0_19 = arith.constant 0 : index
    %23 = vector.load %arg7[%c0_18, %c0_19] : memref<1x128xf32, #tpu.memory_space<vmem>>, vector<1x128xf32>
    %cst_20 = arith.constant dense<0.000000e+00> : vector<128x128xf32>
    %24 = tpu.matmul %21, %22, %cst_20 {dimension_numbers = #tpu.dot_dimension_numbers<[1], [0], [0], [1], [0, 0, 1, 1], [], []>} : vector<128x128xbf16>, vector<128x128xbf16>, vector<128x128xf32> -> vector<128x128xf32>
    %25 = vector.broadcast %23 : vector<1x128xf32> to vector<128x128xf32>
    %26 = arith.addf %24, %25 : vector<128x128xf32>
    %c0_21 = arith.constant 0 : index
    %c0_22 = arith.constant 0 : index
    %27 = vector.load %arg8[%c0_21, %c0_22] : memref<128x128xf32, #tpu.memory_space<vmem>>, vector<128x128xf32>
    tpu.vector_store %arg8[%c0_21, %c0_22], %26 {strides = array<i32>} : memref<128x128xf32, #tpu.memory_space<vmem>>, vector<128x128xf32>,
    return
  }
}

</mosaic_0001>

<bundles_post_ra>
// kernel: tpu_custom_call.1
= control target key start
LH: loop header
LB: loop body
LE: loop exit
PB: predicated region body
PF: predicated region fallthrough
CT: control target
= control target key end

     0   :  { %13 = vsyncpa [#allocation3], 0  ;;  %s1746_s0 = inlined_call_operand.hbm [shape: bf16[128,128], index: 0, kind: input, shape index: {}]   ;;  %s1747_s1 = inlined_call_operand.hbm [shape: bf16[128,128], index: 1, kind: input, shape index: {}]   ;;  %s1748_s2 = inlined_call_operand.hbm [shape: bf16[128,128], index: 2, kind: input, shape index: {}]   ;;  %s1749_s3 = inlined_call_operand.vmem [shape: f32[1,128], index: 3, kind: input, shape index: {}]   ;;  %s1750_s4 = inlined_call_operand.hbm [shape: bf16[128,128], index: 4, kind: input, shape index: {}]   ;;  %s1751_s5 = inlined_call_operand.vmem [shape: f32[1,128], index: 5, kind: input, shape index: {}]   ;;  %s1752_s6 = inlined_call_operand.hbm [shape: bf16[128,128], index: 6, kind: input, shape index: {}]   ;;  %s1753_s7 = inlined_call_operand.vmem [shape: f32[1,128], index: 7, kind: input, shape index: {}]   ;;  %s1754_s8 = inlined_call_operand.hbm [shape: f32[128,128], index: 8, kind: output, shape index: {}]  }
   0x1   :  { %14 = vsyncpa [#allocation6], 0 }
   0x2   :  { %15 = vsyncpa [#allocation9], 0 }
   0x3   :  { %16 = vsyncpa [#allocation4], 0  ;;  %s1513_s27 = smov [#allocation5]   ;;  %s1514_s29 = smov [#allocation8]  }
   0x4   :  { %s34_s28 = sshll.u32 %s1513_s27, 4  ;;  %s60_s30 = sshll.u32 %s1514_s29, 4  ;;  %s35_s28 = int_to_ptr.vmem [resolvable:$true] %s34_s28  ;;  %s1568_s30 = int_to_ptr.vmem [resolvable:$true] %s60_s30 }
   0x5   :  { %s1373_s11 = scalar_lea.hbm %s1747_s1, 1024 }
   0x6   :  { %p1374_p0 = scmp.ne.s32.totalorder %s1747_s1, %s1373_s11  ;;  %p1377_p1 = scmp.lt.u32.totalorder %s1373_s11, %s1747_s1 }
   0x8   :  { %p1379_p2 = pnand %p1377_p1, %p1374_p0 }
   0xa   :  { %1382 = shalt.err (!%p1379_p2)
}
   0xb   :  { %s1383_s16 = scalar_lea.vmem %s35_s28, 1024  ;;  %p1388_p4 = scmp.lt.s32.totalorder %s35_s28, %s35_s28 }
   0xc   :  { %p1384_p3 = scmp.ne.s32.totalorder %s35_s28, %s1383_s16  ;;  %p1389_p5 = scmp.lt.s32.totalorder %s1383_s16, %s1383_s16 }
   0xe   :  { %p1390_p6 = por %p1389_p5, %p1388_p4 }
  0x10   :  { %p1391_p7 = pnand %p1390_p6, %p1384_p3 }
  0x12   :  { %1394 = shalt.err (!%p1391_p7)
}
  0x13   :  { %s1515_s17 = smov 64   ;;  %s1516_s18 = smov 4  }
  0x14   :  { %40 = dma.hbm_to_vmem [thread:$0]  %s1747_s1, 1024, %s35_s28, [#allocation6], %s1515_s17, %s1515_s17, %s1516_s18  }
  0x15   :  { %s1395_s23 = scalar_lea.hbm %s1750_s4, 1024 }
  0x16   :  { %p1396_p8 = scmp.ne.s32.totalorder %s1750_s4, %s1395_s23  ;;  %p1399_p9 = scmp.lt.u32.totalorder %s1395_s23, %s1750_s4 }
  0x18   :  { %p1401_p10 = pnand %p1399_p9, %p1396_p8 }
  0x1a   :  { %1404 = shalt.err (!%p1401_p10)
}
  0x1b   :  { %s1405_s29 = scalar_lea.vmem %s1568_s30, 1024  ;;  %p1410_p12 = scmp.lt.s32.totalorder %s1568_s30, %s1568_s30 }
  0x1c   :  { %p1406_p11 = scmp.ne.s32.totalorder %s1568_s30, %s1405_s29  ;;  %p1411_p13 = scmp.lt.s32.totalorder %s1405_s29, %s1405_s29 }
  0x1e   :  { %p1412_p0 = por %p1411_p13, %p1410_p12 }
  0x20   :  { %p1413_p1 = pnand %p1412_p0, %p1406_p11 }
  0x22   :  { %1416 = shalt.err (!%p1413_p1)
}
  0x23   :  { %66 = dma.hbm_to_vmem [thread:$0]  %s1750_s4, 1024, %s1568_s30, [#allocation9], %s1515_s17, %s1515_s17, %s1516_s18  }
  0x24   :  { %s1517_s9 = smov [#allocation2]   ;;  %s1518_s11 = smov [#allocation7]  }
  0x25   :  { %s22_s10 = sshll.u32 %s1517_s9, 4  ;;  %s46_s12 = sshll.u32 %s1518_s11, 4  ;;  %s23_s10 = int_to_ptr.vmem [resolvable:$true] %s22_s10  ;;  %s1605_s12 = int_to_ptr.vmem [resolvable:$true] %s46_s12 }
  0x26   :  { %s1417_s15 = scalar_lea.hbm %s1746_s0, 1024 }
  0x27   :  { %p1418_p2 = scmp.ne.s32.totalorder %s1746_s0, %s1417_s15  ;;  %p1421_p3 = scmp.lt.u32.totalorder %s1417_s15, %s1746_s0 }
  0x29   :  { %p1423_p4 = pnand %p1421_p3, %p1418_p2 }
  0x2b   :  { %1426 = shalt.err (!%p1423_p4)
}
  0x2c   :  { %s1427_s4 = scalar_lea.vmem %s23_s10, 1024  ;;  %p1432_p6 = scmp.lt.s32.totalorder %s23_s10, %s23_s10 }
  0x2d   :  { %p1428_p5 = scmp.ne.s32.totalorder %s23_s10, %s1427_s4  ;;  %p1433_p7 = scmp.lt.s32.totalorder %s1427_s4, %s1427_s4 }
  0x2f   :  { %p1434_p8 = por %p1433_p7, %p1432_p6 }
  0x31   :  { %p1435_p9 = pnand %p1434_p8, %p1428_p5 }
  0x33   :  { %1438 = shalt.err (!%p1435_p9)
}
  0x34   :  { %28 = dma.hbm_to_vmem [thread:$0]  %s1746_s0, 1024, %s23_s10, [#allocation3], %s1515_s17, %s1515_s17, %s1516_s18  }
  0x35   :  { %s1439_s25 = scalar_lea.hbm %s1748_s2, 1024 }
  0x36   :  { %p1440_p10 = scmp.ne.s32.totalorder %s1748_s2, %s1439_s25  ;;  %p1443_p11 = scmp.lt.u32.totalorder %s1439_s25, %s1748_s2 }
  0x38   :  { %p1445_p12 = pnand %p1443_p11, %p1440_p10 }
  0x3a   :  { %1448 = shalt.err (!%p1445_p12)
}
  0x3b   :  { %s1449_s28 = scalar_lea.vmem %s1605_s12, 1024  ;;  %p1454_p0 = scmp.lt.s32.totalorder %s1605_s12, %s1605_s12 }
  0x3c   :  { %p1450_p13 = scmp.ne.s32.totalorder %s1605_s12, %s1449_s28  ;;  %p1455_p1 = scmp.lt.s32.totalorder %s1449_s28, %s1449_s28 }
  0x3e   :  { %p1456_p2 = por %p1455_p1, %p1454_p0 }
  0x40   :  { %p1457_p3 = pnand %p1456_p2, %p1450_p13 }
  0x42   :  { %1460 = shalt.err (!%p1457_p3)
}
  0x43   :  { %52 = dma.hbm_to_vmem [thread:$0]  %s1748_s2, 1024, %s1605_s12, [#allocation6], %s1515_s17, %s1515_s17, %s1516_s18  }
  0x44   :  { %s1519_s10 = smov [#allocation10]   ;;  %s1461_s15 = scalar_lea.hbm %s1752_s6, 1024 }
  0x45   :  { %s74_s11 = sshll.u32 %s1519_s10, 4  ;;  %p1462_p4 = scmp.ne.s32.totalorder %s1752_s6, %s1461_s15  ;;  %s75_s11 = int_to_ptr.vmem [resolvable:$true] %s74_s11 }
  0x46   :  { %p1465_p5 = scmp.lt.u32.totalorder %s1461_s15, %s1752_s6 }
  0x48   :  { %p1467_p6 = pnand %p1465_p5, %p1462_p4 }
  0x4a   :  { %1470 = shalt.err (!%p1467_p6)
}
  0x4b   :  { %s1471_s4 = scalar_lea.vmem %s75_s11, 1024  ;;  %p1476_p8 = scmp.lt.s32.totalorder %s75_s11, %s75_s11 }
  0x4c   :  { %p1472_p7 = scmp.ne.s32.totalorder %s75_s11, %s1471_s4  ;;  %p1477_p9 = scmp.lt.s32.totalorder %s1471_s4, %s1471_s4 }
  0x4e   :  { %p1478_p10 = por %p1477_p9, %p1476_p8 }
  0x50   :  { %p1479_p11 = pnand %p1478_p10, %p1472_p7 }
  0x52   :  { %1482 = shalt.err (!%p1479_p11)
}
  0x53   :  { %80 = dma.hbm_to_vmem [thread:$0]  %s1752_s6, 1024, %s75_s11, [#allocation9], %s1515_s17, %s1515_s17, %s1516_s18  }
  0x54   :  { %1505 = dma.done.wait [#allocation3], 1024  }
  0x55   :  { %1506 = vsyncadd [#allocation3], 4294966272 }
  0x56   :  { %1507 = dma.done.wait [#allocation6], 2048  }
  0x57   :  { %1508 = vsyncadd [#allocation6], 4294965248 }
  0x58   :  { %1509 = dma.done.wait [#allocation9], 2048  }
  0x59   :  { %1510 = vsyncadd [#allocation9], 4294965248  ;;  %v1333_v0 = vld [vmem:[#allocation7] sm:$0xff]   ;;  %v1334_v1 = vld [vmem:[#allocation7 + $0x8] sm:$0xff]  }
  0x5a   :  { %1147 = vmatprep.subr.bf16.mxu0 %v1333_v0  ;;  %v1335_v2 = vld [vmem:[#allocation7 + $0x10] sm:$0xff]   ;;  %v1336_v3 = vld [vmem:[#allocation7 + $0x18] sm:$0xff]   ;;  %v1341_v4 = vld [vmem:[#allocation5] sm:$0xff]  }
  0x5b   :  { %1148 = vmatpush3.bf16.msra.mxu0 %v1333_v0  ;;  %1163 = vmatprep.mubr.bf16.mxu0 %v1341_v4  ;;  %v1337_v5 = vld [vmem:[#allocation7 + $0x20] sm:$0xff]   ;;  %v1338_v6 = vld [vmem:[#allocation7 + $0x28] sm:$0xff]   ;;  %v1339_v7 = vld [vmem:[#allocation7 + $0x30] sm:$0xff]  }
  0x5c   :  { %1149 = vmatprep.subr.bf16.mxu0 %v1334_v1  ;;  %v1340_v8 = vld [vmem:[#allocation7 + $0x38] sm:$0xff]   ;;  %v1342_v9 = vld [vmem:[#allocation5 + $0x8] sm:$0xff]   ;;  %v1343_v10 = vld [vmem:[#allocation5 + $0x10] sm:$0xff]  }
  0x5d   :  { %v1344_v11 = vld [vmem:[#allocation5 + $0x18] sm:$0xff]   ;;  %v1345_v12 = vld [vmem:[#allocation5 + $0x20] sm:$0xff]   ;;  %v1346_v13 = vld [vmem:[#allocation5 + $0x28] sm:$0xff]  }
  0x5e   :  { %v1347_v14 = vld [vmem:[#allocation5 + $0x30] sm:$0xff]   ;;  %v1348_v15 = vld [vmem:[#allocation5 + $0x38] sm:$0xff]   ;;  %v1657_v16 = vld [vmem:[#allocation2] sm:$0xff]  }
  0x5f   :  { %1150 = vmatpush3.bf16.msra.mxu0 %v1334_v1  ;;  %1195 = vmatprep.mubr.bf16.mxu1 %v1657_v16  ;;  %v1357_v17 = vld [vmem:[#allocation8] sm:$0xff]   ;;  %v1358_v18 = vld [vmem:[#allocation8 + $0x8] sm:$0xff]   ;;  %v1359_v19 = vld [vmem:[#allocation8 + $0x10] sm:$0xff]  }
  0x60   :  { %1151 = vmatprep.subr.bf16.mxu0 %v1335_v2  ;;  %v1360_v20 = vld [vmem:[#allocation8 + $0x18] sm:$0xff]   ;;  %v1361_v21 = vld [vmem:[#allocation8 + $0x20] sm:$0xff]   ;;  %v1362_v22 = vld [vmem:[#allocation8 + $0x28] sm:$0xff]  }
  0x61   :  { %v1024_v24 = vld [vmem:[%s1749_s3] ss:$0 sm:$0xff]  ;;  %v1663_v0 = vld [vmem:[#allocation2 + $0x8] sm:$0xff]   ;;  %v1665_v1 = vld [vmem:[#allocation2 + $0x10] sm:$0xff]  }
  0x62   :  { %v1675_v4 = vld [vmem:[#allocation2 + $0x28] sm:$0xff]  }
  0x63   :  { %1152 = vmatpush3.bf16.msra.mxu0 %v1335_v2  ;;  %v1669_v2 = vld [vmem:[#allocation2 + $0x18] sm:$0xff]  }
  0x64   :  { %1153 = vmatprep.subr.bf16.mxu0 %v1336_v3 }
  0x67   :  { %1154 = vmatpush3.bf16.msra.mxu0 %v1336_v3  ;;  %v1671_v3 = vld [vmem:[#allocation2 + $0x20] sm:$0xff]  }
  0x68   :  { %1155 = vmatprep.subr.bf16.mxu0 %v1337_v5 }
  0x6b   :  { %1156 = vmatpush3.bf16.msra.mxu0 %v1337_v5  ;;  %v1677_v5 = vld [vmem:[#allocation2 + $0x30] sm:$0xff]  }
  0x6c   :  { %1157 = vmatprep.subr.bf16.mxu0 %v1338_v6 }
  0x6f   :  { %1158 = vmatpush3.bf16.msra.mxu0 %v1338_v6  ;;  %v1681_v6 = vld [vmem:[#allocation2 + $0x38] sm:$0xff]  }
  0x70   :  { %1159 = vmatprep.subr.bf16.mxu0 %v1339_v7 }
  0x73   :  { %1160 = vmatpush3.bf16.msra.mxu0 %v1339_v7  ;;  %v1363_v7 = vld [vmem:[#allocation8 + $0x30] sm:$0xff]  }
  0x74   :  { %1161 = vmatprep.subr.bf16.mxu0 %v1340_v8 }
  0x77   :  { %1162 = vmatpush3.bf16.msra.mxu0 %v1340_v8  ;;  %v1364_v8 = vld [vmem:[#allocation8 + $0x38] sm:$0xff]  }
  0x78   :  { %1211 = vmatprep.subr.bf16.mxu0 %v1357_v17 }
  0x7a   :  { %1164 = vmatmul.mubr.bf16.vlgmr.msra.gmra.mrb[0].mxu0 %v1342_v9 }
  0x7b   :  { %1167 = vmatprep.mubr.bf16.mxu0 %v1343_v10  ;;  %1212 = vmatpush3.bf16.msra.mxu0 %v1357_v17 }
  0x7c   :  { %1213 = vmatprep.subr.bf16.mxu0 %v1358_v18 }
  0x7f   :  { %1214 = vmatpush3.bf16.msra.mxu0 %v1358_v18 }
  0x80   :  { %1215 = vmatprep.subr.bf16.mxu0 %v1359_v19 }
  0x82   :  { %1168 = vmatmul.mubr.bf16.gmra.mrb[4].mxu0 %v1344_v11 }
  0x83   :  { %1171 = vmatprep.mubr.bf16.mxu0 %v1345_v12  ;;  %1216 = vmatpush3.bf16.msra.mxu0 %v1359_v19 }
  0x84   :  { %1217 = vmatprep.subr.bf16.mxu0 %v1360_v20 }
  0x87   :  { %1218 = vmatpush3.bf16.msra.mxu0 %v1360_v20 }
  0x88   :  { %1219 = vmatprep.subr.bf16.mxu0 %v1361_v21 }
  0x8a   :  { %1172 = vmatmul.mubr.bf16.gmra.mrb[8].mxu0 %v1346_v13 }
  0x8b   :  { %1175 = vmatprep.mubr.bf16.mxu0 %v1347_v14  ;;  %1220 = vmatpush3.bf16.msra.mxu0 %v1361_v21 }
  0x8c   :  { %1221 = vmatprep.subr.bf16.mxu0 %v1362_v22 }
  0x8f   :  { %1222 = vmatpush3.bf16.msra.mxu0 %v1362_v22 }
  0x90   :  { %1223 = vmatprep.subr.bf16.mxu0 %v1363_v7 }
  0x92   :  { %1176 = vmatmul.mubr.bf16.gmra.mrb[12].mxu0 %v1348_v15 }
  0x93   :  { %1224 = vmatpush3.bf16.msra.mxu0 %v1363_v7 }
  0x94   :  { %1225 = vmatprep.subr.bf16.mxu0 %v1364_v8 }
  0x97   :  { %1226 = vmatpush3.bf16.msra.mxu0 %v1364_v8 }
 0x14d   :  { %v1165_v23 = vpop.f32.mrb[0].mxu0 }
 0x14e   :  { %v284_v25 = vpop.f32.mrb[1].mxu0  ;;  %v293_v27 = vadd.f32 %v1165_v23, %v1024_v24 }
 0x14f   :  { %v1166_v26 = vpop.f32.mrb[2].mxu0  ;;  %v285_v30 = vadd.f32 %v1024_v24, %v284_v25 }
 0x150   :  { %v296_v28 = vadd.f32 %v1166_v26, %v1024_v24  ;;  %v287_v29 = vpop.f32.mrb[3].mxu0 }
 0x151   :  { %v288_v31 = vadd.f32 %v1024_v24, %v287_v29 }
 0x152   :  { %v348_v32 = vpack.c.bf16 %v296_v28, %v293_v27 }
 0x153   :  { %v347_v33 = vpack.c.bf16 %v288_v31, %v285_v30 }
 0x155   :  { %v1169_v34 = vpop.f32.mrb[4].mxu0  ;;  %1179 = vmatprep.subr.bf16.mxu1 %v347_v33 }
 0x156   :  { %v300_v35 = vpop.f32.mrb[5].mxu0  ;;  %1180 = vmatpush3.bf16.msra.mxu1 %v347_v33  ;;  %v309_v37 = vadd.f32 %v1169_v34, %v1024_v24 }
 0x157   :  { %v1170_v36 = vpop.f32.mrb[6].mxu0  ;;  %1181 = vmatprep.subr.bf16.mxu1 %v348_v32  ;;  %v301_v40 = vadd.f32 %v1024_v24, %v300_v35 }
 0x158   :  { %v312_v38 = vadd.f32 %v1170_v36, %v1024_v24  ;;  %v303_v39 = vpop.f32.mrb[7].mxu0 }
 0x159   :  { %v304_v41 = vadd.f32 %v1024_v24, %v303_v39 }
 0x15a   :  { %v350_v42 = vpack.c.bf16 %v312_v38, %v309_v37  ;;  %1182 = vmatpush3.bf16.msra.mxu1 %v348_v32 }
 0x15b   :  { %v349_v43 = vpack.c.bf16 %v304_v41, %v301_v40 }
 0x15d   :  { %v1173_v44 = vpop.f32.mrb[8].mxu0  ;;  %1183 = vmatprep.subr.bf16.mxu1 %v349_v43 }
 0x15e   :  { %v316_v45 = vpop.f32.mrb[9].mxu0  ;;  %1184 = vmatpush3.bf16.msra.mxu1 %v349_v43  ;;  %v325_v47 = vadd.f32 %v1173_v44, %v1024_v24 }
 0x15f   :  { %v1174_v46 = vpop.f32.mrb[10].mxu0  ;;  %1185 = vmatprep.subr.bf16.mxu1 %v350_v42  ;;  %v317_v50 = vadd.f32 %v1024_v24, %v316_v45 }
 0x160   :  { %v328_v48 = vadd.f32 %v1174_v46, %v1024_v24  ;;  %v319_v49 = vpop.f32.mrb[11].mxu0 }
 0x161   :  { %v320_v51 = vadd.f32 %v1024_v24, %v319_v49  ;;  %v1685_v49 = vld [vmem:[#allocation10] sm:$0xff]  }
 0x162   :  { %v352_v52 = vpack.c.bf16 %v328_v48, %v325_v47  ;;  %1186 = vmatpush3.bf16.msra.mxu1 %v350_v42  ;;  %1275 = vmatprep.subr.bf16.mxu0 %v1685_v49 }
 0x163   :  { %v351_v53 = vpack.c.bf16 %v320_v51, %v317_v50  ;;  %v1687_v50 = vld [vmem:[#allocation10 + $0x8] sm:$0xff]   ;;  %v1692_v51 = vld [vmem:[#allocation10 + $0x10] sm:$0xff]  }
 0x165   :  { %v1177_v54 = vpop.f32.mrb[12].mxu0  ;;  %1187 = vmatprep.subr.bf16.mxu1 %v351_v53 }
 0x166   :  { %v332_v55 = vpop.f32.mrb[13].mxu0  ;;  %1188 = vmatpush3.bf16.msra.mxu1 %v351_v53  ;;  %v341_v57 = vadd.f32 %v1177_v54, %v1024_v24  ;;  %v1700_v53 = vld [vmem:[#allocation10 + $0x20] sm:$0xff]   ;;  %v1704_v54 = vld [vmem:[#allocation10 + $0x28] sm:$0xff]  }
 0x167   :  { %v1178_v56 = vpop.f32.mrb[14].mxu0  ;;  %1189 = vmatprep.subr.bf16.mxu1 %v352_v52  ;;  %v333_v60 = vadd.f32 %v1024_v24, %v332_v55 }
 0x168   :  { %v344_v58 = vadd.f32 %v1178_v56, %v1024_v24  ;;  %v335_v59 = vpop.f32.mrb[15].mxu0  ;;  %v1049_v56 = vld [vmem:[%s1751_s5] ss:$0 sm:$0xff] }
 0x169   :  { %v336_v61 = vadd.f32 %v1024_v24, %v335_v59 }
 0x16a   :  { %v354_v62 = vpack.c.bf16 %v344_v58, %v341_v57  ;;  %1190 = vmatpush3.bf16.msra.mxu1 %v352_v52  ;;  %v1696_v52 = vld [vmem:[#allocation10 + $0x18] sm:$0xff]  }
 0x16b   :  { %v353_v63 = vpack.c.bf16 %v336_v61, %v333_v60 }
 0x16d   :  { %1191 = vmatprep.subr.bf16.mxu1 %v353_v63 }
 0x16e   :  { %1192 = vmatpush3.bf16.msra.mxu1 %v353_v63 }
 0x16f   :  { %1193 = vmatprep.subr.bf16.mxu1 %v354_v62 }
 0x172   :  { %1194 = vmatpush3.bf16.msra.mxu1 %v354_v62 }
 0x175   :  { %1196 = vmatmul.mubr.bf16.vlgmr.msra.gmra.mrb[0].mxu1 %v1663_v0 }
 0x176   :  { %1199 = vmatprep.mubr.bf16.mxu1 %v1665_v1 }
 0x17d   :  { %1200 = vmatmul.mubr.bf16.gmra.mrb[4].mxu1 %v1669_v2 }
 0x17e   :  { %1203 = vmatprep.mubr.bf16.mxu1 %v1671_v3 }
 0x185   :  { %1204 = vmatmul.mubr.bf16.gmra.mrb[8].mxu1 %v1675_v4 }
 0x186   :  { %1207 = vmatprep.mubr.bf16.mxu1 %v1677_v5 }
 0x18d   :  { %1208 = vmatmul.mubr.bf16.gmra.mrb[12].mxu1 %v1681_v6 }
 0x18e   :  { %1259 = vmatprep.mubr.bf16.mxu1 %v1657_v16 }
 0x248   :  { %v1197_v9 = vpop.f32.mrb[0].mxu1 }
 0x249   :  { %v437_v10 = vpop.f32.mrb[1].mxu1  ;;  %v502_v12 = vmax.f32 %v1197_v9, 0.0 }
 0x24a   :  { %v1198_v11 = vpop.f32.mrb[2].mxu1  ;;  %v500_v15 = vmax.f32 %v437_v10, 0.0 }
 0x24b   :  { %v503_v13 = vmax.f32 %v1198_v11, 0.0  ;;  %v440_v14 = vpop.f32.mrb[3].mxu1 }
 0x24c   :  { %v501_v17 = vmax.f32 %v440_v14, 0.0 }
 0x24d   :  { %v517_v18 = vpack.c.bf16 %v503_v13, %v502_v12 }
 0x24e   :  { %v516_v19 = vpack.c.bf16 %v501_v17, %v500_v15 }
 0x250   :  { %v1201_v20 = vpop.f32.mrb[4].mxu1  ;;  %1227 = vmatprep.mubr.bf16.mxu0 %v516_v19 }
 0x251   :  { %v453_v21 = vpop.f32.mrb[5].mxu1  ;;  %1228 = vmatmul.mubr.bf16.vlgmr.msra.gmra.mrb[16].mxu0 %v517_v18  ;;  %v506_v22 = vmax.f32 %v1201_v20, 0.0 }
 0x252   :  { %v1202_v16 = vpop.f32.mrb[6].mxu1  ;;  %v504_v25 = vmax.f32 %v453_v21, 0.0  ;;  %1276 = vmatpush3.bf16.msra.mxu0 %v1685_v49 }
 0x253   :  { %v507_v23 = vmax.f32 %v1202_v16, 0.0  ;;  %v456_v24 = vpop.f32.mrb[7].mxu1  ;;  %1277 = vmatprep.subr.bf16.mxu0 %v1687_v50 }
 0x254   :  { %v505_v26 = vmax.f32 %v456_v24, 0.0 }
 0x255   :  { %v519_v27 = vpack.c.bf16 %v507_v23, %v506_v22 }
 0x256   :  { %v518_v28 = vpack.c.bf16 %v505_v26, %v504_v25  ;;  %1278 = vmatpush3.bf16.msra.mxu0 %v1687_v50 }
 0x257   :  { %1279 = vmatprep.subr.bf16.mxu0 %v1692_v51 }
 0x258   :  { %v1205_v29 = vpop.f32.mrb[8].mxu1  ;;  %1231 = vmatprep.mubr.bf16.mxu0 %v518_v28 }
 0x259   :  { %v469_v30 = vpop.f32.mrb[9].mxu1  ;;  %1232 = vmatmul.mubr.bf16.gmra.mrb[20].mxu0 %v519_v27  ;;  %v510_v32 = vmax.f32 %v1205_v29, 0.0 }
 0x25a   :  { %v1206_v31 = vpop.f32.mrb[10].mxu1  ;;  %v508_v35 = vmax.f32 %v469_v30, 0.0  ;;  %1280 = vmatpush3.bf16.msra.mxu0 %v1692_v51 }
 0x25b   :  { %v511_v33 = vmax.f32 %v1206_v31, 0.0  ;;  %v472_v34 = vpop.f32.mrb[11].mxu1  ;;  %1281 = vmatprep.subr.bf16.mxu0 %v1696_v52 }
 0x25c   :  { %v509_v36 = vmax.f32 %v472_v34, 0.0 }
 0x25d   :  { %v521_v37 = vpack.c.bf16 %v511_v33, %v510_v32 }
 0x25e   :  { %v520_v38 = vpack.c.bf16 %v509_v36, %v508_v35  ;;  %1282 = vmatpush3.bf16.msra.mxu0 %v1696_v52 }
 0x25f   :  { %1283 = vmatprep.subr.bf16.mxu0 %v1700_v53 }
 0x260   :  { %v1209_v39 = vpop.f32.mrb[12].mxu1  ;;  %1235 = vmatprep.mubr.bf16.mxu0 %v520_v38 }
 0x261   :  { %v485_v40 = vpop.f32.mrb[13].mxu1  ;;  %1236 = vmatmul.mubr.bf16.gmra.mrb[24].mxu0 %v521_v37  ;;  %v514_v42 = vmax.f32 %v1209_v39, 0.0 }
 0x262   :  { %v1210_v41 = vpop.f32.mrb[14].mxu1  ;;  %v512_v45 = vmax.f32 %v485_v40, 0.0  ;;  %1284 = vmatpush3.bf16.msra.mxu0 %v1700_v53 }
 0x263   :  { %v515_v43 = vmax.f32 %v1210_v41, 0.0  ;;  %v488_v44 = vpop.f32.mrb[15].mxu1  ;;  %1285 = vmatprep.subr.bf16.mxu0 %v1704_v54 }
 0x264   :  { %v513_v46 = vmax.f32 %v488_v44, 0.0 }
 0x265   :  { %v523_v47 = vpack.c.bf16 %v515_v43, %v514_v42 }
 0x266   :  { %v522_v48 = vpack.c.bf16 %v513_v46, %v512_v45  ;;  %1286 = vmatpush3.bf16.msra.mxu0 %v1704_v54 }
 0x268   :  { %1239 = vmatprep.mubr.bf16.mxu0 %v522_v48 }
 0x269   :  { %1240 = vmatmul.mubr.bf16.gmra.mrb[28].mxu0 %v523_v47 }
 0x324   :  { %v1229_v55 = vpop.f32.mrb[16].mxu0 }
 0x325   :  { %v629_v57 = vpop.f32.mrb[17].mxu0  ;;  %v638_v59 = vadd.f32 %v1229_v55, %v1049_v56 }
 0x326   :  { %v1230_v58 = vpop.f32.mrb[18].mxu0  ;;  %v630_v62 = vadd.f32 %v1049_v56, %v629_v57 }
 0x327   :  { %v641_v60 = vadd.f32 %v1230_v58, %v1049_v56  ;;  %v632_v61 = vpop.f32.mrb[19].mxu0 }
 0x328   :  { %v633_v63 = vadd.f32 %v1049_v56, %v632_v61 }
 0x329   :  { %v693_v7 = vpack.c.bf16 %v641_v60, %v638_v59 }
 0x32a   :  { %v692_v8 = vpack.c.bf16 %v633_v63, %v630_v62 }
 0x32c   :  { %v1233_v9 = vpop.f32.mrb[20].mxu0  ;;  %1243 = vmatprep.subr.bf16.mxu1 %v692_v8 }
 0x32d   :  { %v645_v10 = vpop.f32.mrb[21].mxu0  ;;  %1244 = vmatpush3.bf16.msra.mxu1 %v692_v8  ;;  %v654_v12 = vadd.f32 %v1233_v9, %v1049_v56 }
 0x32e   :  { %v1234_v11 = vpop.f32.mrb[22].mxu0  ;;  %1245 = vmatprep.subr.bf16.mxu1 %v693_v7  ;;  %v646_v15 = vadd.f32 %v1049_v56, %v645_v10 }
 0x32f   :  { %v657_v13 = vadd.f32 %v1234_v11, %v1049_v56  ;;  %v648_v14 = vpop.f32.mrb[23].mxu0 }
 0x330   :  { %v649_v17 = vadd.f32 %v1049_v56, %v648_v14 }
 0x331   :  { %v695_v18 = vpack.c.bf16 %v657_v13, %v654_v12  ;;  %1246 = vmatpush3.bf16.msra.mxu1 %v693_v7 }
 0x332   :  { %v694_v19 = vpack.c.bf16 %v649_v17, %v646_v15 }
 0x334   :  { %v1237_v20 = vpop.f32.mrb[24].mxu0  ;;  %1247 = vmatprep.subr.bf16.mxu1 %v694_v19 }
 0x335   :  { %v661_v21 = vpop.f32.mrb[25].mxu0  ;;  %1248 = vmatpush3.bf16.msra.mxu1 %v694_v19  ;;  %v670_v22 = vadd.f32 %v1237_v20, %v1049_v56 }
 0x336   :  { %v1238_v16 = vpop.f32.mrb[26].mxu0  ;;  %1249 = vmatprep.subr.bf16.mxu1 %v695_v18  ;;  %v662_v25 = vadd.f32 %v1049_v56, %v661_v21 }
 0x337   :  { %v673_v23 = vadd.f32 %v1238_v16, %v1049_v56  ;;  %v664_v24 = vpop.f32.mrb[27].mxu0 }
 0x338   :  { %v665_v26 = vadd.f32 %v1049_v56, %v664_v24 }
 0x339   :  { %v697_v27 = vpack.c.bf16 %v673_v23, %v670_v22  ;;  %1250 = vmatpush3.bf16.msra.mxu1 %v695_v18  ;;  %v1058_v18 = vld [vmem:[%s1753_s7] ss:$0 sm:$0xff]  ;;  %s1520_s7 = smov [#allocation11]  }
 0x33a   :  { %v696_v28 = vpack.c.bf16 %v665_v26, %v662_v25  ;;  %s1010_s22 = sshll.u32 %s1520_s7, 4  ;;  %s1011_s22 = int_to_ptr.vmem [resolvable:$true] %s1010_s22 }
 0x33b   :  { %s1483_s23 = scalar_lea.vmem %s1011_s22, 2048  ;;  %p1488_p13 = scmp.lt.s32.totalorder %s1011_s22, %s1011_s22 }
 0x33c   :  { %v1241_v29 = vpop.f32.mrb[28].mxu0  ;;  %1251 = vmatprep.subr.bf16.mxu1 %v696_v28  ;;  %p1484_p12 = scmp.ne.s32.totalorder %s1011_s22, %s1483_s23  ;;  %p1489_p0 = scmp.lt.s32.totalorder %s1483_s23, %s1483_s23 }
 0x33d   :  { %v677_v30 = vpop.f32.mrb[29].mxu0  ;;  %1252 = vmatpush3.bf16.msra.mxu1 %v696_v28  ;;  %v686_v32 = vadd.f32 %v1241_v29, %v1049_v56 }
 0x33e   :  { %v1242_v31 = vpop.f32.mrb[30].mxu0  ;;  %1253 = vmatprep.subr.bf16.mxu1 %v697_v27  ;;  %v678_v35 = vadd.f32 %v1049_v56, %v677_v30  ;;  %p1490_p1 = por %p1489_p0, %p1488_p13 }
 0x33f   :  { %v689_v33 = vadd.f32 %v1242_v31, %v1049_v56  ;;  %v680_v34 = vpop.f32.mrb[31].mxu0 }
 0x340   :  { %v681_v36 = vadd.f32 %v1049_v56, %v680_v34  ;;  %p1491_p2 = pnand %p1490_p1, %p1484_p12 }
 0x341   :  { %v699_v37 = vpack.c.bf16 %v689_v33, %v686_v32  ;;  %1254 = vmatpush3.bf16.msra.mxu1 %v697_v27 }
 0x342   :  { %v698_v38 = vpack.c.bf16 %v681_v36, %v678_v35 }
 0x344   :  { %1255 = vmatprep.subr.bf16.mxu1 %v698_v38 }
 0x345   :  { %1256 = vmatpush3.bf16.msra.mxu1 %v698_v38 }
 0x346   :  { %1257 = vmatprep.subr.bf16.mxu1 %v699_v37 }
 0x349   :  { %1258 = vmatpush3.bf16.msra.mxu1 %v699_v37 }
 0x34a   :  { %1307 = vmatprep.subr.bf16.mxu1 %v1685_v49 }
 0x34c   :  { %1260 = vmatmul.mubr.bf16.vlgmr.msra.gmra.mrb[16].mxu1 %v1663_v0  ;;  %v1371_v0 = vld [vmem:[#allocation10 + $0x30] sm:$0xff]  }
 0x34d   :  { %1263 = vmatprep.mubr.bf16.mxu1 %v1665_v1  ;;  %1315 = vmatpush3.bf16.msra.mxu1 %v1685_v49  ;;  %v1372_v1 = vld [vmem:[#allocation10 + $0x38] sm:$0xff]  }
 0x34e   :  { %1308 = vmatprep.subr.bf16.mxu1 %v1687_v50  ;;  %1287 = vmatprep.subr.bf16.mxu0 %v1371_v0 }
 0x34f   :  { %1288 = vmatpush3.bf16.msra.mxu0 %v1371_v0 }
 0x350   :  { %1289 = vmatprep.subr.bf16.mxu0 %v1372_v1 }
 0x351   :  { %1316 = vmatpush3.bf16.msra.mxu1 %v1687_v50 }
 0x352   :  { %1309 = vmatprep.subr.bf16.mxu1 %v1692_v51 }
 0x353   :  { %1290 = vmatpush3.bf16.msra.mxu0 %v1372_v1 }
 0x354   :  { %1264 = vmatmul.mubr.bf16.gmra.mrb[20].mxu1 %v1669_v2 }
 0x355   :  { %1267 = vmatprep.mubr.bf16.mxu1 %v1671_v3  ;;  %1317 = vmatpush3.bf16.msra.mxu1 %v1692_v51 }
 0x356   :  { %1310 = vmatprep.subr.bf16.mxu1 %v1696_v52 }
 0x359   :  { %1318 = vmatpush3.bf16.msra.mxu1 %v1696_v52 }
 0x35a   :  { %1311 = vmatprep.subr.bf16.mxu1 %v1700_v53 }
 0x35c   :  { %1268 = vmatmul.mubr.bf16.gmra.mrb[24].mxu1 %v1675_v4 }
 0x35d   :  { %1271 = vmatprep.mubr.bf16.mxu1 %v1677_v5  ;;  %1319 = vmatpush3.bf16.msra.mxu1 %v1700_v53 }
 0x35e   :  { %1312 = vmatprep.subr.bf16.mxu1 %v1704_v54 }
 0x361   :  { %1320 = vmatpush3.bf16.msra.mxu1 %v1704_v54 }
 0x362   :  { %1313 = vmatprep.subr.bf16.mxu1 %v1371_v0 }
 0x364   :  { %1272 = vmatmul.mubr.bf16.gmra.mrb[28].mxu1 %v1681_v6 }
 0x365   :  { %1321 = vmatpush3.bf16.msra.mxu1 %v1371_v0 }
 0x366   :  { %1314 = vmatprep.subr.bf16.mxu1 %v1372_v1 }
 0x369   :  { %1322 = vmatpush3.bf16.msra.mxu1 %v1372_v1 }
 0x41f   :  { %v1261_v2 = vpop.f32.mrb[16].mxu1 }
 0x420   :  { %v734_v3 = vpop.f32.mrb[17].mxu1  ;;  %v799_v5 = vmax.f32 %v1261_v2, 0.0 }
 0x421   :  { %v1262_v4 = vpop.f32.mrb[18].mxu1  ;;  %v797_v41 = vmax.f32 %v734_v3, 0.0 }
 0x422   :  { %v800_v39 = vmax.f32 %v1262_v4, 0.0  ;;  %v737_v40 = vpop.f32.mrb[19].mxu1 }
 0x423   :  { %v798_v42 = vmax.f32 %v737_v40, 0.0 }
 0x424   :  { %v814_v43 = vpack.c.bf16 %v800_v39, %v799_v5 }
 0x425   :  { %v813_v6 = vpack.c.bf16 %v798_v42, %v797_v41 }
 0x427   :  { %v1265_v44 = vpop.f32.mrb[20].mxu1  ;;  %1291 = vmatprep.mubr.bf16.mxu0 %v813_v6 }
 0x428   :  { %v750_v45 = vpop.f32.mrb[21].mxu1  ;;  %1292 = vmatmul.mubr.bf16.vlgmr.msra.gmra.mrb[32].mxu0 %v814_v43  ;;  %v803_v47 = vmax.f32 %v1265_v44, 0.0 }
 0x429   :  { %v1266_v46 = vpop.f32.mrb[22].mxu1  ;;  %v801_v50 = vmax.f32 %v750_v45, 0.0 }
 0x42a   :  { %v804_v48 = vmax.f32 %v1266_v46, 0.0  ;;  %v753_v49 = vpop.f32.mrb[23].mxu1 }
 0x42b   :  { %v802_v51 = vmax.f32 %v753_v49, 0.0 }
 0x42c   :  { %v816_v52 = vpack.c.bf16 %v804_v48, %v803_v47 }
 0x42d   :  { %v815_v53 = vpack.c.bf16 %v802_v51, %v801_v50 }
 0x42f   :  { %v1269_v54 = vpop.f32.mrb[24].mxu1  ;;  %1295 = vmatprep.mubr.bf16.mxu0 %v815_v53 }
 0x430   :  { %v766_v55 = vpop.f32.mrb[25].mxu1  ;;  %1296 = vmatmul.mubr.bf16.gmra.mrb[36].mxu0 %v816_v52  ;;  %v807_v57 = vmax.f32 %v1269_v54, 0.0 }
 0x431   :  { %v1270_v56 = vpop.f32.mrb[26].mxu1  ;;  %v805_v60 = vmax.f32 %v766_v55, 0.0 }
 0x432   :  { %v808_v58 = vmax.f32 %v1270_v56, 0.0  ;;  %v769_v59 = vpop.f32.mrb[27].mxu1 }
 0x433   :  { %v806_v61 = vmax.f32 %v769_v59, 0.0 }
 0x434   :  { %v818_v62 = vpack.c.bf16 %v808_v58, %v807_v57 }
 0x435   :  { %v817_v63 = vpack.c.bf16 %v806_v61, %v805_v60 }
 0x437   :  { %v1273_v7 = vpop.f32.mrb[28].mxu1  ;;  %1299 = vmatprep.mubr.bf16.mxu1 %v817_v63 }
 0x438   :  { %v782_v8 = vpop.f32.mrb[29].mxu1  ;;  %1300 = vmatmul.mubr.bf16.vlgmr.msra.gmra.mrb[32].mxu1 %v818_v62  ;;  %v811_v10 = vmax.f32 %v1273_v7, 0.0 }
 0x439   :  { %v1274_v9 = vpop.f32.mrb[30].mxu1  ;;  %v809_v13 = vmax.f32 %v782_v8, 0.0 }
 0x43a   :  { %v812_v11 = vmax.f32 %v1274_v9, 0.0  ;;  %v785_v12 = vpop.f32.mrb[31].mxu1 }
 0x43b   :  { %v810_v14 = vmax.f32 %v785_v12, 0.0 }
 0x43c   :  { %v820_v15 = vpack.c.bf16 %v812_v11, %v811_v10 }
 0x43d   :  { %v819_v17 = vpack.c.bf16 %v810_v14, %v809_v13 }
 0x43f   :  { %1303 = vmatprep.mubr.bf16.mxu1 %v819_v17 }
 0x440   :  { %1304 = vmatmul.mubr.bf16.gmra.mrb[36].mxu1 %v820_v15 }
 0x4fb   :  { %v1293_v19 = vpop.f32.mrb[32].mxu0 }
 0x4fc   :  { %v935_v20 = vadd.f32 %v1293_v19, %v1058_v18  ;;  %v926_v21 = vpop.f32.mrb[33].mxu0 }
 0x4fd   :  { %v927_v16 = vadd.f32 %v1058_v18, %v926_v21  ;;  %v1294_v22 = vpop.f32.mrb[34].mxu0 }
 0x4fe   :  { %991 = vst [vmem:[#allocation11 + $0x10] sm:$0xff] %v935_v20  ;;  %v938_v23 = vadd.f32 %v1294_v22, %v1058_v18  ;;  %v929_v24 = vpop.f32.mrb[35].mxu0 }
 0x4ff   :  { %989 = vst [vmem:[#allocation11] sm:$0xff] %v927_v16  ;;  %v930_v25 = vadd.f32 %v1058_v18, %v929_v24 }
 0x500   :  { %992 = vst [vmem:[#allocation11 + $0x18] sm:$0xff] %v938_v23 }
 0x501   :  { %990 = vst [vmem:[#allocation11 + $0x8] sm:$0xff] %v930_v25 }
 0x503   :  { %v1297_v26 = vpop.f32.mrb[36].mxu0 }
 0x504   :  { %v951_v27 = vadd.f32 %v1297_v26, %v1058_v18  ;;  %v942_v28 = vpop.f32.mrb[37].mxu0 }
 0x505   :  { %v943_v29 = vadd.f32 %v1058_v18, %v942_v28  ;;  %v1298_v30 = vpop.f32.mrb[38].mxu0 }
 0x506   :  { %995 = vst [vmem:[#allocation11 + $0x30] sm:$0xff] %v951_v27  ;;  %v954_v31 = vadd.f32 %v1298_v30, %v1058_v18  ;;  %v945_v32 = vpop.f32.mrb[39].mxu0 }
 0x507   :  { %993 = vst [vmem:[#allocation11 + $0x20] sm:$0xff] %v943_v29  ;;  %v946_v33 = vadd.f32 %v1058_v18, %v945_v32 }
 0x508   :  { %996 = vst [vmem:[#allocation11 + $0x38] sm:$0xff] %v954_v31 }
 0x509   :  { %994 = vst [vmem:[#allocation11 + $0x28] sm:$0xff] %v946_v33 }
 0x50b   :  { %v1301_v34 = vpop.f32.mrb[32].mxu1 }
 0x50c   :  { %v967_v35 = vadd.f32 %v1301_v34, %v1058_v18  ;;  %v958_v36 = vpop.f32.mrb[33].mxu1 }
 0x50d   :  { %v959_v37 = vadd.f32 %v1058_v18, %v958_v36  ;;  %v1302_v38 = vpop.f32.mrb[34].mxu1 }
 0x50e   :  { %999 = vst [vmem:[#allocation11 + $0x50] sm:$0xff] %v967_v35  ;;  %v970_v0 = vadd.f32 %v1302_v38, %v1058_v18  ;;  %v961_v1 = vpop.f32.mrb[35].mxu1 }
 0x50f   :  { %997 = vst [vmem:[#allocation11 + $0x40] sm:$0xff] %v959_v37  ;;  %v962_v2 = vadd.f32 %v1058_v18, %v961_v1 }
 0x510   :  { %1000 = vst [vmem:[#allocation11 + $0x58] sm:$0xff] %v970_v0 }
 0x511   :  { %998 = vst [vmem:[#allocation11 + $0x48] sm:$0xff] %v962_v2 }
 0x513   :  { %v1305_v3 = vpop.f32.mrb[36].mxu1 }
 0x514   :  { %v983_v4 = vadd.f32 %v1305_v3, %v1058_v18  ;;  %v974_v5 = vpop.f32.mrb[37].mxu1 }
 0x515   :  { %v975_v39 = vadd.f32 %v1058_v18, %v974_v5  ;;  %v1306_v40 = vpop.f32.mrb[38].mxu1 }
 0x516   :  { %1003 = vst [vmem:[#allocation11 + $0x70] sm:$0xff] %v983_v4  ;;  %v986_v41 = vadd.f32 %v1306_v40, %v1058_v18  ;;  %v977_v42 = vpop.f32.mrb[39].mxu1 }
 0x517   :  { %1001 = vst [vmem:[#allocation11 + $0x60] sm:$0xff] %v975_v39  ;;  %v978_v43 = vadd.f32 %v1058_v18, %v977_v42 }
 0x518   :  { %1004 = vst [vmem:[#allocation11 + $0x78] sm:$0xff] %v986_v41 }
 0x519   :  { %1002 = vst [vmem:[#allocation11 + $0x68] sm:$0xff] %v978_v43 }
 0x51a   :  { %1494 = shalt.err (!%p1491_p2)
}
 0x51b   :  { %s1495_s26 = scalar_lea.hbm %s1754_s8, 2048 }
 0x51c   :  { %p1496_p3 = scmp.ne.s32.totalorder %s1754_s8, %s1495_s26  ;;  %p1499_p4 = scmp.lt.u32.totalorder %s1495_s26, %s1754_s8 }
 0x51e   :  { %p1501_p5 = pnand %p1499_p4, %p1496_p3 }
 0x520   :  { %1504 = shalt.err (!%p1501_p5)
}
 0x521   :  { %s1521_s0 = smov 128   ;;  %s1522_s9 = smov 8  }
 0x522   :  { %1016 = dma.vmem_to_hbm [thread:$0]  %s1011_s22, 2048, %s1754_s8, [#allocation4], %s1521_s0, %s1521_s0, %s1522_s9  }
 0x523   :  { %1511 = dma.done.wait [#allocation4], 2048  }
 0x524   :  { %1512 = vsyncadd [#allocation4], 4294965248 }
 0x525   :  { %1020 = vsyncpa [#allocation3], 1 }
 0x526   :  { %1021 = vsyncpa [#allocation6], 1 }
 0x527   :  { %1022 = vsyncpa [#allocation9], 1 }
 0x528   :  { %1023 = vsyncpa [#allocation4], 1 }

</bundles_post_ra>
